<compile_context>
chip_gen: v7x
topology: tpu7x:2x2x1
jax: 0.10.0
libtpu: 0.0.40
codegen_flags: <defaults>
</compile_context>

<pallas_src>
import functools

import jax
import jax.numpy as jnp
import numpy as np
from jax.experimental import pallas as pl
from jax.experimental.pallas import tpu as pltpu

LANE = 128


def _round_up(x, m):
    return (x + m - 1) // m * m


# ----------------------------- Pallas kernels -------------------------------

def _linear_kernel(x_ref, w_ref, b_ref, o_ref):
    """o = x @ w + b   (x: [br, K], w: [K, Npad], b: [1, Npad], o: [br, Npad])."""
    acc = jnp.dot(x_ref[...], w_ref[...], preferred_element_type=jnp.float32)
    o_ref[...] = (acc + b_ref[...]).astype(o_ref.dtype)


def _head_fused_kernel(x_ref, cls_w_ref, cls_b_ref,
                       w1_ref, b1_ref, w2_ref, b2_ref, w3_ref, b3_ref,
                       logits_ref, boxes_ref):
    """Fused DETR heads: class_embed Linear + bbox_embed 3-layer MLP + sigmoid.

    Reads the hs tile once; both outputs are written as dense 128-lane slabs.
    """
    x = x_ref[...]
    # class head (lane-padded output, one dense store)
    logits = jnp.dot(x, cls_w_ref[...], preferred_element_type=jnp.float32) + cls_b_ref[...]
    logits_ref[...] = logits.astype(logits_ref.dtype)
    # bbox head: MLP(D, D, 4, 3) + sigmoid (matches MLP.forward + .sigmoid())
    h = jnp.dot(x, w1_ref[...], preferred_element_type=jnp.float32) + b1_ref[...]
    h = jnp.maximum(h, 0.0)
    h = jnp.dot(h, w2_ref[...], preferred_element_type=jnp.float32) + b2_ref[...]
    h = jnp.maximum(h, 0.0)
    y = jnp.dot(h, w3_ref[...], preferred_element_type=jnp.float32) + b3_ref[...]
    boxes_ref[...] = jax.nn.sigmoid(y).astype(boxes_ref.dtype)


# ----------------------------- Pallas wrappers -------------------------------

def _pick_block_rows(R, target):
    """Row-tile size: multiple of 8, capped at target, covering R after padding."""
    return min(target, _round_up(R, 8))


def pallas_linear_padded(x2d, w_pad, b_pad, n_valid, *, block_rows=256):
    """(R, K) @ (K, Npad) + (1, Npad), row-tiled 'parallel' grid; returns (R, n_valid)."""
    R, K = x2d.shape
    Npad = w_pad.shape[1]
    br = _pick_block_rows(R, block_rows)
    Rp = _round_up(R, br)
    xp = jnp.pad(x2d, ((0, Rp - R), (0, 0))) if Rp != R else x2d
    grid = (Rp // br,)
    cost = pl.CostEstimate(
        flops=2 * Rp * K * Npad + Rp * Npad,
        transcendentals=0,
        bytes_accessed=4 * (Rp * K + K * Npad + Npad + Rp * Npad),
    )
    out = pl.pallas_call(
        _linear_kernel,
        out_shape=jax.ShapeDtypeStruct((Rp, Npad), x2d.dtype),
        grid=grid,
        in_specs=[
            pl.BlockSpec((br, K), lambda i: (i, 0)),
            pl.BlockSpec((K, Npad), lambda i: (0, 0)),
            pl.BlockSpec((1, Npad), lambda i: (0, 0)),
        ],
        out_specs=pl.BlockSpec((br, Npad), lambda i: (i, 0)),
        compiler_params=pltpu.CompilerParams(dimension_semantics=("parallel",)),
        cost_estimate=cost,
    )(xp, w_pad, b_pad)
    return out[:R, :n_valid]


def pallas_detr_heads(hs2, p, *, block_rows=256):
    """Fused class_embed + bbox_embed on hs2 (R, D). Returns (logits (R, ncls+1), boxes (R, 4))."""
    R, D = hs2.shape
    ncls1 = p["cls_w"].shape[1]
    Ncls_p = p["cls_w_pad"].shape[1]
    Nbox_p = p["bb3_w_pad"].shape[1]
    Hh = p["bb1_w"].shape[1]

    br = _pick_block_rows(R, block_rows)
    Rp = _round_up(R, br)
    xp = jnp.pad(hs2, ((0, Rp - R), (0, 0))) if Rp != R else hs2
    grid = (Rp // br,)

    flops = 2 * Rp * D * (Ncls_p + Hh) + 2 * Rp * Hh * Hh + 2 * Rp * Hh * Nbox_p
    bytes_acc = 4 * (Rp * D + Rp * (Ncls_p + Nbox_p)
                     + D * (Ncls_p + Hh) + Hh * Hh + Hh * Nbox_p
                     + Ncls_p + 2 * Hh + Nbox_p)
    cost = pl.CostEstimate(flops=flops, transcendentals=Rp * Nbox_p, bytes_accessed=bytes_acc)

    logits_pad, boxes_pad = pl.pallas_call(
        _head_fused_kernel,
        out_shape=(jax.ShapeDtypeStruct((Rp, Ncls_p), hs2.dtype),
                   jax.ShapeDtypeStruct((Rp, Nbox_p), hs2.dtype)),
        grid=grid,
        in_specs=[
            pl.BlockSpec((br, D), lambda i: (i, 0)),
            pl.BlockSpec((D, Ncls_p), lambda i: (0, 0)),
            pl.BlockSpec((1, Ncls_p), lambda i: (0, 0)),
            pl.BlockSpec((D, Hh), lambda i: (0, 0)),
            pl.BlockSpec((1, Hh), lambda i: (0, 0)),
            pl.BlockSpec((Hh, Hh), lambda i: (0, 0)),
            pl.BlockSpec((1, Hh), lambda i: (0, 0)),
            pl.BlockSpec((Hh, Nbox_p), lambda i: (0, 0)),
            pl.BlockSpec((1, Nbox_p), lambda i: (0, 0)),
        ],
        out_specs=(pl.BlockSpec((br, Ncls_p), lambda i: (i, 0)),
                   pl.BlockSpec((br, Nbox_p), lambda i: (i, 0))),
        compiler_params=pltpu.CompilerParams(dimension_semantics=("parallel",)),
        cost_estimate=cost,
    )(xp, p["cls_w_pad"], p["cls_b_pad"],
      p["bb1_w"], p["bb1_b2d"], p["bb2_w"], p["bb2_b2d"],
      p["bb3_w_pad"], p["bb3_b_pad"])
    return logits_pad[:R, :ncls1], boxes_pad[:R, :4]


# ----------------------- parameter prep (done once, outside jit) --------------

def prepare_pallas_params(params, lane=LANE):
    """Pre-pad weights/biases to 128-lane-dense shapes so kernel stores are unmasked."""
    p = dict(params)

    def pad_w(w):
        K, N = w.shape
        Np = _round_up(N, lane)
        return jnp.pad(w, ((0, 0), (0, Np - N)))

    def pad_b(b):
        N = b.shape[0]
        Np = _round_up(N, lane)
        return jnp.pad(b, (0, Np - N)).reshape(1, Np)

    # input_proj (1x1 conv as matmul)
    p["proj_w_pad"] = pad_w(params["proj_w"])
    p["proj_b_pad"] = pad_b(params["proj_b"])
    # class_embed
    p["cls_w_pad"] = pad_w(params["cls_w"])
    p["cls_b_pad"] = pad_b(params["cls_b"])
    # bbox_embed final layer (only layer whose output hits HBM)
    p["bb3_w_pad"] = pad_w(params["bb3_w"])
    p["bb3_b_pad"] = pad_b(params["bb3_b"])
    # bbox_embed hidden biases as (1, H) rows (intermediates stay in vregs)
    p["bb1_b2d"] = params["bb1_b"].reshape(1, -1)
    p["bb2_b2d"] = params["bb2_b"].reshape(1, -1)
    return p


# --------------------- external injected modules (stand-ins) -----------------

def backbone_stub(samples, bb_w):
    # TODO(synk): real backbone (ResNet) is an externally injected nn.Module; deterministic stand-in.
    B, Cin, Hin, Win = samples.shape
    x = samples.reshape(B, Cin, Hin // 2, 2, Win // 2, 2).mean(axis=(3, 5))  # 2x2 avg-pool
    src_nhwc = jnp.einsum("bchw,cd->bhwd", x, bb_w)                           # NHWC, channel lift Cin -> C
    H, W = src_nhwc.shape[1], src_nhwc.shape[2]
    mask = jnp.zeros((B, H, W), dtype=bool)
    return src_nhwc, mask


def pos_embed_stub(B, D, H, W):
    # deterministic sine positional embedding in token layout, shape (B, H*W, D)
    ys = jnp.arange(H, dtype=jnp.float32)[:, None, None]
    xs = jnp.arange(W, dtype=jnp.float32)[None, :, None]
    ch = jnp.arange(D, dtype=jnp.float32)[None, None, :]
    pos = jnp.sin(ch * 0.1 + ys * 0.3) + jnp.cos(ch * 0.07 + xs * 0.2)        # (H, W, D)
    return jnp.broadcast_to(pos.reshape(1, H * W, D), (B, H * W, D)) * 0.1


def transformer_stub(proj_rows, bhwd, mask, query_embed, pos_bld, num_layers):
    # TODO(synk): real DETR transformer is an externally injected nn.Module; deterministic
    # single-head cross-attention decoder stand-in producing hs of shape (L, B, Q, D).
    B, H, W, D = bhwd
    mem = proj_rows.reshape(B, H * W, D) + pos_bld                            # (B, HW, D), no transposes
    Q = query_embed.shape[0]
    tgt = jnp.zeros((B, Q, D), dtype=proj_rows.dtype)
    q = query_embed[None]
    layers = []
    for _ in range(num_layers):
        scores = jnp.einsum("bqd,bkd->bqk", tgt + q, mem) / jnp.sqrt(jnp.float32(D))
        attn = jax.nn.softmax(scores, axis=-1)
        tgt = tgt + jnp.einsum("bqk,bkd->bqd", attn, mem)
        layers.append(tgt)
    hs = jnp.stack(layers, axis=0)                                            # (L, B, Q, D)
    return hs, mem, {}


# ----------------------------------- DETR ------------------------------------

def detr_forward(samples, params, *, num_decoder_layers):
    # backbone (external) -> NHWC feature map
    src_nhwc, mask = backbone_stub(samples, params["bb_w"])
    B, H, W, C = src_nhwc.shape
    D = params["proj_w"].shape[1]
    pos = pos_embed_stub(B, D, H, W)

    # input_proj: 1x1 conv == per-token matmul (Pallas, lane-dense padded output)
    src_rows = src_nhwc.reshape(B * H * W, C)
    proj_rows = pallas_linear_padded(src_rows, params["proj_w_pad"], params["proj_b_pad"],
                                     n_valid=D, block_rows=256)

    # transformer (external)
    hs, memory, extra = transformer_stub(proj_rows, (B, H, W, D), mask,
                                         params["query_embed"], pos, num_decoder_layers)
    L, B_, Qn, D_ = hs.shape
    hs2 = hs.reshape(L * B_ * Qn, D_)

    # fused class_embed + bbox_embed heads (Pallas, reads hs once)
    logits2, boxes2 = pallas_detr_heads(hs2, params, block_rows=256)
    ncls1 = params["cls_w"].shape[1]
    outputs_class = logits2.reshape(L, B_, Qn, ncls1)
    outputs_coord = boxes2.reshape(L, B_, Qn, 4)

    src_nchw = jnp.transpose(src_nhwc, (0, 3, 1, 2))   # only for the 'bb' output (torch layout)
    out = {
        "pred_logits": outputs_class[-1],
        "pred_boxes": outputs_coord[-1],
        "pred_features": hs[-1],
        "bb": src_nchw,
        **extra,
    }
    return out, hs, src_nchw


# --------------------------------- reference ----------------------------------

def reference_heads(hs, src_nchw, params):
    """Plain-JAX reference for the Pallas-implemented pieces."""
    proj_rows = (jnp.transpose(src_nchw, (0, 2, 3, 1)).reshape(-1, params["proj_w"].shape[0])
                 @ params["proj_w"] + params["proj_b"])
    logits = hs @ params["cls_w"] + params["cls_b"]
    h = jnp.maximum(hs @ params["bb1_w"] + params["bb1_b"], 0.0)
    h = jnp.maximum(h @ params["bb2_w"] + params["bb2_b"], 0.0)
    boxes = jax.nn.sigmoid(h @ params["bb3_w"] + params["bb3_b"])
    return proj_rows, logits, boxes


# ----------------------------------- main -------------------------------------

if __name__ == "__main__":
    # small config
    B, Cin, Hin, Win = 2, 3, 16, 16       # samples.tensor: [batch, 3, H, W]
    C = 8                                  # backbone.num_channels
    D = 32                                 # transformer.d_model (hidden_dim)
    NUM_CLASSES = 10                       # -> num_classes + 1 = 11 logits
    NUM_QUERIES = 8
    NUM_DEC_LAYERS = 3

    key = jax.random.PRNGKey(0)
    ks = jax.random.split(key, 12)
    f32 = jnp.float32

    samples = jax.random.normal(ks[0], (B, Cin, Hin, Win), dtype=f32)

    params = {
        # backbone stand-in channel lift
        "bb_w": 0.2 * jax.random.normal(ks[1], (Cin, C), dtype=f32),
        # input_proj: Conv2d(C, D, kernel_size=1)  -> stored as (C, D) matmul weight
        "proj_w": 0.1 * jax.random.normal(ks[2], (C, D), dtype=f32),
        "proj_b": 0.1 * jax.random.normal(ks[3], (D,), dtype=f32),
        # class_embed: Linear(D, num_classes + 1)
        "cls_w": 0.1 * jax.random.normal(ks[4], (D, NUM_CLASSES + 1), dtype=f32),
        "cls_b": 0.1 * jax.random.normal(ks[5], (NUM_CLASSES + 1,), dtype=f32),
        # bbox_embed: MLP(D, D, 4, 3)
        "bb1_w": 0.1 * jax.random.normal(ks[6], (D, D), dtype=f32),
        "bb1_b": 0.1 * jax.random.normal(ks[7], (D,), dtype=f32),
        "bb2_w": 0.1 * jax.random.normal(ks[8], (D, D), dtype=f32),
        "bb2_b": 0.1 * jax.random.normal(ks[9], (D,), dtype=f32),
        "bb3_w": 0.1 * jax.random.normal(ks[10], (D, 4), dtype=f32),
        "bb3_b": 0.1 * jax.random.normal(ks[11], (4,), dtype=f32),
        # query_embed: nn.Embedding(num_queries, hidden_dim).weight
        "query_embed": 0.1 * jax.random.normal(jax.random.PRNGKey(42), (NUM_QUERIES, D), dtype=f32),
    }
    params = prepare_pallas_params(params)   # pad weights/biases to 128 lanes once, outside jit

    fwd = jax.jit(functools.partial(detr_forward, num_decoder_layers=NUM_DEC_LAYERS))
    out, hs, src = fwd(samples, params)
    jax.block_until_ready(out)

    # shape checks
    assert out["pred_logits"].shape == (B, NUM_QUERIES, NUM_CLASSES + 1)
    assert out["pred_boxes"].shape == (B, NUM_QUERIES, 4)
    assert out["pred_features"].shape == (B, NUM_QUERIES, D)
    assert out["bb"].shape == (B, C, Hin // 2, Win // 2)

    # numeric check of the Pallas-implemented heads vs plain-JAX reference
    proj_ref_rows, logits_ref, boxes_ref = reference_heads(hs, src, params)
    src_rows = jnp.transpose(src, (0, 2, 3, 1)).reshape(-1, C)
    proj_pallas_rows = pallas_linear_padded(src_rows, params["proj_w_pad"], params["proj_b_pad"],
                                            n_valid=D, block_rows=256)
    np.testing.assert_allclose(np.asarray(proj_pallas_rows), np.asarray(proj_ref_rows),
                               rtol=1e-5, atol=1e-5)
    np.testing.assert_allclose(np.asarray(out["pred_logits"]), np.asarray(logits_ref[-1]),
                               rtol=1e-5, atol=1e-5)
    np.testing.assert_allclose(np.asarray(out["pred_boxes"]), np.asarray(boxes_ref[-1]),
                               rtol=1e-5, atol=1e-5)

    print("KERNEL_OK")
</pallas_src>

<mosaic_0001>
module attributes {stable_mosaic.version = 11 : i64} {
  func.func @_linear_kernel(%arg0: i32, %arg1: memref<128x8xf32, #tpu.memory_space<vmem>>, %arg2: memref<8x128xf32, #tpu.memory_space<vmem>>, %arg3: memref<1x128xf32, #tpu.memory_space<vmem>>, %arg4: memref<128x128xf32, #tpu.memory_space<vmem>>) attributes {dimension_semantics = [#tpu.dimension_semantics<parallel>], iteration_bounds = array<i64: 1>, scalar_prefetch = 0 : i64, scratch_operands = 0 : i64, tpu.core_type = #tpu.core_type<tc>, window_params = [{transform_indices = @transform_0, window_bounds = array<i64: 128, 8>}, {pipeline_mode = #tpu.pipeline_mode<synchronous>, transform_indices = @transform_1, window_bounds = array<i64: 8, 128>}, {pipeline_mode = #tpu.pipeline_mode<synchronous>, transform_indices = @transform_2, window_bounds = array<i64: 1, 128>}, {transform_indices = @transform_3, window_bounds = array<i64: 128, 128>}]} {
    %c0 = arith.constant 0 : index
    %c0_0 = arith.constant 0 : index
    %0 = vector.load %arg1[%c0, %c0_0] : memref<128x8xf32, #tpu.memory_space<vmem>>, vector<128x8xf32>
    %c0_1 = arith.constant 0 : index
    %c0_2 = arith.constant 0 : index
    %1 = vector.load %arg2[%c0_1, %c0_2] : memref<8x128xf32, #tpu.memory_space<vmem>>, vector<8x128xf32>
    %cst = arith.constant dense<0.000000e+00> : vector<128x128xf32>
    %2 = tpu.matmul %0, %1, %cst {dimension_numbers = #tpu.dot_dimension_numbers<[1], [0], [0], [1], [0, 0, 1, 1], [], []>} : vector<128x8xf32>, vector<8x128xf32>, vector<128x128xf32> -> vector<128x128xf32>
    %c0_3 = arith.constant 0 : index
    %c0_4 = arith.constant 0 : index
    %3 = vector.load %arg3[%c0_3, %c0_4] : memref<1x128xf32, #tpu.memory_space<vmem>>, vector<1x128xf32>
    %4 = vector.broadcast %3 : vector<1x128xf32> to vector<128x128xf32>
    %5 = arith.addf %2, %4 : vector<128x128xf32>
    %c0_5 = arith.constant 0 : index
    %c0_6 = arith.constant 0 : index
    %6 = vector.load %arg4[%c0_5, %c0_6] : memref<128x128xf32, #tpu.memory_space<vmem>>, vector<128x128xf32>
    tpu.vector_store %arg4[%c0_5, %c0_6], %5 {strides = array<i32>} : memref<128x128xf32, #tpu.memory_space<vmem>>, vector<128x128xf32>,
    return
  }
  func.func @transform_0(%arg0: i32) -> (i32, i32) {
    %c0_i32 = arith.constant 0 : i32
    %c0_i32_0 = arith.constant 0 : i32
    return %arg0, %c0_i32 : i32, i32
  }
  func.func @transform_1(%arg0: i32) -> (i32, i32) {
    %c0_i32 = arith.constant 0 : i32
    %c0_i32_0 = arith.constant 0 : i32
    %c0_i32_1 = arith.constant 0 : i32
    return %c0_i32, %c0_i32_0 : i32, i32
  }
  func.func @transform_2(%arg0: i32) -> (i32, i32) {
    %c0_i32 = arith.constant 0 : i32
    %c0_i32_0 = arith.constant 0 : i32
    %c0_i32_1 = arith.constant 0 : i32
    return %c0_i32, %c0_i32_0 : i32, i32
  }
  func.func @transform_3(%arg0: i32) -> (i32, i32) {
    %c0_i32 = arith.constant 0 : i32
    %c0_i32_0 = arith.constant 0 : i32
    return %arg0, %c0_i32 : i32, i32
  }
}

module attributes {stable_mosaic.version = 11 : i64} {
  func.func @_head_fused_kernel(%arg0: i32, %arg1: memref<48x32xf32, #tpu.memory_space<vmem>>, %arg2: memref<32x128xf32, #tpu.memory_space<vmem>>, %arg3: memref<1x128xf32, #tpu.memory_space<vmem>>, %arg4: memref<32x32xf32, #tpu.memory_space<vmem>>, %arg5: memref<1x32xf32, #tpu.memory_space<vmem>>, %arg6: memref<32x32xf32, #tpu.memory_space<vmem>>, %arg7: memref<1x32xf32, #tpu.memory_space<vmem>>, %arg8: memref<32x128xf32, #tpu.memory_space<vmem>>, %arg9: memref<1x128xf32, #tpu.memory_space<vmem>>, %arg10: memref<48x128xf32, #tpu.memory_space<vmem>>, %arg11: memref<48x128xf32, #tpu.memory_space<vmem>>) attributes {dimension_semantics = [#tpu.dimension_semantics<parallel>], iteration_bounds = array<i64: 1>, scalar_prefetch = 0 : i64, scratch_operands = 0 : i64, tpu.core_type = #tpu.core_type<tc>, window_params = [{transform_indices = @transform_0, window_bounds = array<i64: 48, 32>}, {pipeline_mode = #tpu.pipeline_mode<synchronous>, transform_indices = @transform_1, window_bounds = array<i64: 32, 128>}, {pipeline_mode = #tpu.pipeline_mode<synchronous>, transform_indices = @transform_2, window_bounds = array<i64: 1, 128>}, {pipeline_mode = #tpu.pipeline_mode<synchronous>, transform_indices = @transform_3, window_bounds = array<i64: 32, 32>}, {pipeline_mode = #tpu.pipeline_mode<synchronous>, transform_indices = @transform_4, window_bounds = array<i64: 1, 32>}, {pipeline_mode = #tpu.pipeline_mode<synchronous>, transform_indices = @transform_5, window_bounds = array<i64: 32, 32>}, {pipeline_mode = #tpu.pipeline_mode<synchronous>, transform_indices = @transform_6, window_bounds = array<i64: 1, 32>}, {pipeline_mode = #tpu.pipeline_mode<synchronous>, transform_indices = @transform_7, window_bounds = array<i64: 32, 128>}, {pipeline_mode = #tpu.pipeline_mode<synchronous>, transform_indices = @transform_8, window_bounds = array<i64: 1, 128>}, {transform_indices = @transform_9, window_bounds = array<i64: 48, 128>}, {transform_indices = @transform_10, window_bounds = array<i64: 48, 128>}]} {
    %c0 = arith.constant 0 : index
    %c0_0 = arith.constant 0 : index
    %0 = vector.load %arg1[%c0, %c0_0] : memref<48x32xf32, #tpu.memory_space<vmem>>, vector<48x32xf32>
    %c0_1 = arith.constant 0 : index
    %c0_2 = arith.constant 0 : index
    %1 = vector.load %arg2[%c0_1, %c0_2] : memref<32x128xf32, #tpu.memory_space<vmem>>, vector<32x128xf32>
    %cst = arith.constant dense<0.000000e+00> : vector<48x128xf32>
    %2 = tpu.matmul %0, %1, %cst {dimension_numbers = #tpu.dot_dimension_numbers<[1], [0], [0], [1], [0, 0, 1, 1], [], []>} : vector<48x32xf32>, vector<32x128xf32>, vector<48x128xf32> -> vector<48x128xf32>
    %c0_3 = arith.constant 0 : index
    %c0_4 = arith.constant 0 : index
    %3 = vector.load %arg3[%c0_3, %c0_4] : memref<1x128xf32, #tpu.memory_space<vmem>>, vector<1x128xf32>
    %4 = vector.broadcast %3 : vector<1x128xf32> to vector<48x128xf32>
    %5 = arith.addf %2, %4 : vector<48x128xf32>
    %c0_5 = arith.constant 0 : index
    %c0_6 = arith.constant 0 : index
    %6 = vector.load %arg10[%c0_5, %c0_6] : memref<48x128xf32, #tpu.memory_space<vmem>>, vector<48x128xf32>
    tpu.vector_store %arg10[%c0_5, %c0_6], %5 {strides = array<i32>} : memref<48x128xf32, #tpu.memory_space<vmem>>, vector<48x128xf32>,
    %c0_7 = arith.constant 0 : index
    %c0_8 = arith.constant 0 : index
    %7 = vector.load %arg4[%c0_7, %c0_8] : memref<32x32xf32, #tpu.memory_space<vmem>>, vector<32x32xf32>
    %cst_9 = arith.constant dense<0.000000e+00> : vector<48x32xf32>
    %8 = tpu.matmul %0, %7, %cst_9 {dimension_numbers = #tpu.dot_dimension_numbers<[1], [0], [0], [1], [0, 0, 1, 1], [], []>} : vector<48x32xf32>, vector<32x32xf32>, vector<48x32xf32> -> vector<48x32xf32>
    %c0_10 = arith.constant 0 : index
    %c0_11 = arith.constant 0 : index
    %9 = vector.load %arg5[%c0_10, %c0_11] : memref<1x32xf32, #tpu.memory_space<vmem>>, vector<1x32xf32>
    %10 = vector.broadcast %9 : vector<1x32xf32> to vector<48x32xf32>
    %11 = arith.addf %8, %10 : vector<48x32xf32>
    %cst_12 = arith.constant 0.000000e+00 : f32
    %12 = vector.broadcast %cst_12 : f32 to vector<48x32xf32>
    %13 = arith.maximumf %11, %12 : vector<48x32xf32>
    %c0_13 = arith.constant 0 : index
    %c0_14 = arith.constant 0 : index
    %14 = vector.load %arg6[%c0_13, %c0_14] : memref<32x32xf32, #tpu.memory_space<vmem>>, vector<32x32xf32>
    %cst_15 = arith.constant dense<0.000000e+00> : vector<48x32xf32>
    %15 = tpu.matmul %13, %14, %cst_15 {dimension_numbers = #tpu.dot_dimension_numbers<[1], [0], [0], [1], [0, 0, 1, 1], [], []>} : vector<48x32xf32>, vector<32x32xf32>, vector<48x32xf32> -> vector<48x32xf32>
    %c0_16 = arith.constant 0 : index
    %c0_17 = arith.constant 0 : index
    %16 = vector.load %arg7[%c0_16, %c0_17] : memref<1x32xf32, #tpu.memory_space<vmem>>, vector<1x32xf32>
    %17 = vector.broadcast %16 : vector<1x32xf32> to vector<48x32xf32>
    %18 = arith.addf %15, %17 : vector<48x32xf32>
    %cst_18 = arith.constant 0.000000e+00 : f32
    %19 = vector.broadcast %cst_18 : f32 to vector<48x32xf32>
    %20 = arith.maximumf %18, %19 : vector<48x32xf32>
    %c0_19 = arith.constant 0 : index
    %c0_20 = arith.constant 0 : index
    %21 = vector.load %arg8[%c0_19, %c0_20] : memref<32x128xf32, #tpu.memory_space<vmem>>, vector<32x128xf32>
    %cst_21 = arith.constant dense<0.000000e+00> : vector<48x128xf32>
    %22 = tpu.matmul %20, %21, %cst_21 {dimension_numbers = #tpu.dot_dimension_numbers<[1], [0], [0], [1], [0, 0, 1, 1], [], []>} : vector<48x32xf32>, vector<32x128xf32>, vector<48x128xf32> -> vector<48x128xf32>
    %c0_22 = arith.constant 0 : index
    %c0_23 = arith.constant 0 : index
    %23 = vector.load %arg9[%c0_22, %c0_23] : memref<1x128xf32, #tpu.memory_space<vmem>>, vector<1x128xf32>
    %24 = vector.broadcast %23 : vector<1x128xf32> to vector<48x128xf32>
    %25 = arith.addf %22, %24 : vector<48x128xf32>
    %26 = arith.negf %25 : vector<48x128xf32>
    %27 = math.exp %26 : vector<48x128xf32>
    %cst_24 = arith.constant 1.000000e+00 : f32
    %28 = vector.broadcast %cst_24 : f32 to vector<48x128xf32>
    %29 = arith.addf %28, %27 : vector<48x128xf32>
    %30 = arith.divf %28, %29 : vector<48x128xf32>
    %c0_25 = arith.constant 0 : index
    %c0_26 = arith.constant 0 : index
    %31 = vector.load %arg11[%c0_25, %c0_26] : memref<48x128xf32, #tpu.memory_space<vmem>>, vector<48x128xf32>
    tpu.vector_store %arg11[%c0_25, %c0_26], %30 {strides = array<i32>} : memref<48x128xf32, #tpu.memory_space<vmem>>, vector<48x128xf32>,
    return
  }
  func.func @transform_0(%arg0: i32) -> (i32, i32) {
    %c0_i32 = arith.constant 0 : i32
    %c0_i32_0 = arith.constant 0 : i32
    return %arg0, %c0_i32 : i32, i32
  }
  func.func @transform_1(%arg0: i32) -> (i32, i32) {
    %c0_i32 = arith.constant 0 : i32
    %c0_i32_0 = arith.constant 0 : i32
    %c0_i32_1 = arith.constant 0 : i32
    return %c0_i32, %c0_i32_0 : i32, i32
  }
  func.func @transform_2(%arg0: i32) -> (i32, i32) {
    %c0_i32 = arith.constant 0 : i32
    %c0_i32_0 = arith.constant 0 : i32
    %c0_i32_1 = arith.constant 0 : i32
    return %c0_i32, %c0_i32_0 : i32, i32
  }
  func.func @transform_3(%arg0: i32) -> (i32, i32) {
    %c0_i32 = arith.constant 0 : i32
    %c0_i32_0 = arith.constant 0 : i32
    %c0_i32_1 = arith.constant 0 : i32
    return %c0_i32, %c0_i32_0 : i32, i32
  }
  func.func @transform_4(%arg0: i32) -> (i32, i32) {
    %c0_i32 = arith.constant 0 : i32
    %c0_i32_0 = arith.constant 0 : i32
    %c0_i32_1 = arith.constant 0 : i32
    return %c0_i32, %c0_i32_0 : i32, i32
  }
  func.func @transform_5(%arg0: i32) -> (i32, i32) {
    %c0_i32 = arith.constant 0 : i32
    %c0_i32_0 = arith.constant 0 : i32
    %c0_i32_1 = arith.constant 0 : i32
    return %c0_i32, %c0_i32_0 : i32, i32
  }
  func.func @transform_6(%arg0: i32) -> (i32, i32) {
    %c0_i32 = arith.constant 0 : i32
    %c0_i32_0 = arith.constant 0 : i32
    %c0_i32_1 = arith.constant 0 : i32
    return %c0_i32, %c0_i32_0 : i32, i32
  }
  func.func @transform_7(%arg0: i32) -> (i32, i32) {
    %c0_i32 = arith.constant 0 : i32
    %c0_i32_0 = arith.constant 0 : i32
    %c0_i32_1 = arith.constant 0 : i32
    return %c0_i32, %c0_i32_0 : i32, i32
  }
  func.func @transform_8(%arg0: i32) -> (i32, i32) {
    %c0_i32 = arith.constant 0 : i32
    %c0_i32_0 = arith.constant 0 : i32
    %c0_i32_1 = arith.constant 0 : i32
    return %c0_i32, %c0_i32_0 : i32, i32
  }
  func.func @transform_9(%arg0: i32) -> (i32, i32) {
    %c0_i32 = arith.constant 0 : i32
    %c0_i32_0 = arith.constant 0 : i32
    return %arg0, %c0_i32 : i32, i32
  }
  func.func @transform_10(%arg0: i32) -> (i32, i32) {
    %c0_i32 = arith.constant 0 : i32
    %c0_i32_0 = arith.constant 0 : i32
    return %arg0, %c0_i32 : i32, i32
  }
}

</mosaic_0001>

<bundles_post_ra>
// kernel: detr_forward.2
= control target key start
LH: loop header
LB: loop body
LE: loop exit
PB: predicated region body
PF: predicated region fallthrough
CT: control target
= control target key end

     0   :  { %vm38_vm0 = vcmask 64512   ;;  %s452_s1 = inlined_call_operand.vmem [shape: f32[8,128], index: 1, kind: input, shape index: {}]   ;;  %s453_s0 = inlined_call_operand.vmem [shape: f32[128,8], index: 0, kind: input, shape index: {}]   ;;  %s454_s2 = inlined_call_operand.vmem [shape: f32[1,128], index: 2, kind: input, shape index: {}]   ;;  %s455_s3 = inlined_call_operand.vmem [shape: f32[128,128], index: 3, kind: output, shape index: {}]  }
   0x1   :  { %v30_v0 = vld [vmem:[%s452_s1] sm:$0xff]  ;;  %v15_v3 = vld [vmem:[%s453_s0 + $0x8] sm:$0xff]  ;;  %v16_v5 = vld [vmem:[%s453_s0 + $0x10] sm:$0xff] }
   0x2   :  { %v14_v1 = vld [vmem:[%s453_s0] sm:$0xff]  ;;  %286 = vmatprep.subr.mxu0 %v30_v0  ;;  %312 = vmatprep.subr.mxu1 %v30_v0  ;;  %v23_v4 = vld [vmem:[%s453_s0 + $0x48] sm:$0xff]  ;;  %v24_v6 = vld [vmem:[%s453_s0 + $0x50] sm:$0xff] }
   0x3   :  { %v22_v2 = vld [vmem:[%s453_s0 + $0x40] sm:$0xff]  ;;  %287 = vmatpush3.msra.mxu0 %v30_v0  ;;  %313 = vmatpush3.msra.mxu1 %v30_v0  ;;  %v17_v7 = vld [vmem:[%s453_s0 + $0x18] sm:$0xff]  ;;  %v19_v11 = vld [vmem:[%s453_s0 + $0x28] sm:$0xff] }
   0x4   :  { %288 = vmatprep.mubr.msk.f32.mxu0 %vm38_vm0, %v14_v1  ;;  %300 = vmatprep.mubr.msk.f32.mxu1 %vm38_vm0, %v22_v2  ;;  %v25_v8 = vld [vmem:[%s453_s0 + $0x58] sm:$0xff]  ;;  %v18_v9 = vld [vmem:[%s453_s0 + $0x20] sm:$0xff]  ;;  %v27_v12 = vld [vmem:[%s453_s0 + $0x68] sm:$0xff] }
   0x5   :  { %289 = vmatmul.mubr.msk.f32.vlgmr.msra.gmra.mrb[0].mxu0 %vm38_vm0, %v15_v3  ;;  %301 = vmatmul.mubr.msk.f32.vlgmr.msra.gmra.mrb[0].mxu1 %vm38_vm0, %v23_v4  ;;  %v26_v10 = vld [vmem:[%s453_s0 + $0x60] sm:$0xff]  ;;  %v20_v13 = vld [vmem:[%s453_s0 + $0x30] sm:$0xff]  ;;  %v21_v15 = vld [vmem:[%s453_s0 + $0x38] sm:$0xff] }
   0x6   :  { %291 = vmatprep.mubr.msk.f32.mxu0 %vm38_vm0, %v16_v5  ;;  %303 = vmatprep.mubr.msk.f32.mxu1 %vm38_vm0, %v24_v6  ;;  %v28_v14 = vld [vmem:[%s453_s0 + $0x70] sm:$0xff]  ;;  %v29_v16 = vld [vmem:[%s453_s0 + $0x78] sm:$0xff]  ;;  %v252_v17 = vld [vmem:[%s454_s2] ss:$0 sm:$0xff] }
   0x9   :  { %292 = vmatmul.mubr.msk.f32.gmra.mrb[2].mxu0 %vm38_vm0, %v17_v7  ;;  %304 = vmatmul.mubr.msk.f32.gmra.mrb[2].mxu1 %vm38_vm0, %v25_v8 }
   0xa   :  { %294 = vmatprep.mubr.msk.f32.mxu0 %vm38_vm0, %v18_v9  ;;  %306 = vmatprep.mubr.msk.f32.mxu1 %vm38_vm0, %v26_v10 }
   0xd   :  { %295 = vmatmul.mubr.msk.f32.gmra.mrb[4].mxu0 %vm38_vm0, %v19_v11  ;;  %307 = vmatmul.mubr.msk.f32.gmra.mrb[4].mxu1 %vm38_vm0, %v27_v12 }
   0xe   :  { %297 = vmatprep.mubr.msk.f32.mxu0 %vm38_vm0, %v20_v13  ;;  %309 = vmatprep.mubr.msk.f32.mxu1 %vm38_vm0, %v28_v14 }
  0x11   :  { %298 = vmatmul.mubr.msk.f32.gmra.mrb[6].mxu0 %vm38_vm0, %v21_v15  ;;  %310 = vmatmul.mubr.msk.f32.gmra.mrb[6].mxu1 %vm38_vm0, %v29_v16 }
  0xd8   :  { %v290_v18 = vpop.f32.mrb[0].mxu0  ;;  %v302_v19 = vpop.f32.mrb[0].mxu1 }
  0xd9   :  { %v159_v20 = vadd.f32 %v290_v18, %v252_v17  ;;  %v199_v21 = vadd.f32 %v302_v19, %v252_v17  ;;  %v153_v22 = vpop.f32.mrb[1].mxu0  ;;  %v193_v23 = vpop.f32.mrb[1].mxu1 }
  0xda   :  { %v154_v24 = vadd.f32 %v252_v17, %v153_v22  ;;  %v194_v25 = vadd.f32 %v252_v17, %v193_v23 }
  0xdb   :  { %233 = vst [vmem:[%s455_s3 + $0x8] sm:$0xff] %v159_v20  ;;  %241 = vst [vmem:[%s455_s3 + $0x48] sm:$0xff] %v199_v21 }
  0xdc   :  { %232 = vst [vmem:[%s455_s3] sm:$0xff] %v154_v24  ;;  %240 = vst [vmem:[%s455_s3 + $0x40] sm:$0xff] %v194_v25  ;;  %v293_v26 = vpop.f32.mrb[2].mxu0  ;;  %v305_v27 = vpop.f32.mrb[2].mxu1 }
  0xdd   :  { %v169_v28 = vadd.f32 %v293_v26, %v252_v17  ;;  %v209_v29 = vadd.f32 %v305_v27, %v252_v17  ;;  %v163_v30 = vpop.f32.mrb[3].mxu0  ;;  %v203_v31 = vpop.f32.mrb[3].mxu1 }
  0xde   :  { %v164_v32 = vadd.f32 %v252_v17, %v163_v30  ;;  %v204_v33 = vadd.f32 %v252_v17, %v203_v31 }
  0xdf   :  { %235 = vst [vmem:[%s455_s3 + $0x18] sm:$0xff] %v169_v28  ;;  %243 = vst [vmem:[%s455_s3 + $0x58] sm:$0xff] %v209_v29 }
  0xe0   :  { %234 = vst [vmem:[%s455_s3 + $0x10] sm:$0xff] %v164_v32  ;;  %242 = vst [vmem:[%s455_s3 + $0x50] sm:$0xff] %v204_v33  ;;  %v296_v34 = vpop.f32.mrb[4].mxu0  ;;  %v308_v35 = vpop.f32.mrb[4].mxu1 }
  0xe1   :  { %v179_v36 = vadd.f32 %v296_v34, %v252_v17  ;;  %v219_v37 = vadd.f32 %v308_v35, %v252_v17  ;;  %v173_v38 = vpop.f32.mrb[5].mxu0  ;;  %v213_v39 = vpop.f32.mrb[5].mxu1 }
  0xe2   :  { %v174_v40 = vadd.f32 %v252_v17, %v173_v38  ;;  %v214_v41 = vadd.f32 %v252_v17, %v213_v39 }
  0xe3   :  { %237 = vst [vmem:[%s455_s3 + $0x28] sm:$0xff] %v179_v36  ;;  %245 = vst [vmem:[%s455_s3 + $0x68] sm:$0xff] %v219_v37 }
  0xe4   :  { %236 = vst [vmem:[%s455_s3 + $0x20] sm:$0xff] %v174_v40  ;;  %244 = vst [vmem:[%s455_s3 + $0x60] sm:$0xff] %v214_v41  ;;  %v299_v42 = vpop.f32.mrb[6].mxu0  ;;  %v311_v43 = vpop.f32.mrb[6].mxu1 }
  0xe5   :  { %v189_v44 = vadd.f32 %v299_v42, %v252_v17  ;;  %v229_v45 = vadd.f32 %v311_v43, %v252_v17  ;;  %v183_v46 = vpop.f32.mrb[7].mxu0  ;;  %v223_v47 = vpop.f32.mrb[7].mxu1 }
  0xe6   :  { %v184_v48 = vadd.f32 %v252_v17, %v183_v46  ;;  %v224_v49 = vadd.f32 %v252_v17, %v223_v47 }
  0xe7   :  { %239 = vst [vmem:[%s455_s3 + $0x38] sm:$0xff] %v189_v44  ;;  %247 = vst [vmem:[%s455_s3 + $0x78] sm:$0xff] %v229_v45 }
  0xe8   :  { %238 = vst [vmem:[%s455_s3 + $0x30] sm:$0xff] %v184_v48  ;;  %246 = vst [vmem:[%s455_s3 + $0x70] sm:$0xff] %v224_v49 }

// kernel: detr_forward.3
= control target key start
LH: loop header
LB: loop body
LE: loop exit
PB: predicated region body
PF: predicated region fallthrough
CT: control target
= control target key end

     0   :  { %vm51_vm0 = vcmask 261120   ;;  %s978_s3 = inlined_call_operand.vmem [shape: f32[32,32], index: 3, kind: input, shape index: {}]   ;;  %s979_s0 = inlined_call_operand.vmem [shape: f32[48,32], index: 0, kind: input, shape index: {}]   ;;  %s980_s1 = inlined_call_operand.vmem [shape: f32[32,128], index: 1, kind: input, shape index: {}]   ;;  %s981_s5 = inlined_call_operand.vmem [shape: f32[32,32], index: 5, kind: input, shape index: {}]   ;;  %s982_s7 = inlined_call_operand.vmem [shape: f32[32,128], index: 7, kind: input, shape index: {}]   ;;  %s983_s4 = inlined_call_operand.vmem [shape: f32[1,32], index: 4, kind: input, shape index: {}]   ;;  %s984_s2 = inlined_call_operand.vmem [shape: f32[1,128], index: 2, kind: input, shape index: {}]   ;;  %s985_s9 = inlined_call_operand.vmem [shape: f32[48,128], index: 9, kind: output, shape index: {0}]   ;;  %s986_s6 = inlined_call_operand.vmem [shape: f32[1,32], index: 6, kind: input, shape index: {}]   ;;  %s987_s8 = inlined_call_operand.vmem [shape: f32[1,128], index: 8, kind: input, shape index: {}]   ;;  %s988_s10 = inlined_call_operand.vmem [shape: f32[48,128], index: 10, kind: output, shape index: {1}]  }
   0x1   :  { %v171_v0 = vld [vmem:[%s978_s3] sm:$0xff]  ;;  %v172_v1 = vld [vmem:[%s978_s3 + $0x8] sm:$0xff]  ;;  %v173_v2 = vld [vmem:[%s978_s3 + $0x10] sm:$0xff] }
   0x2   :  { %v737_v3 = vpack.c.bf16 %v172_v1, %v171_v0  ;;  %v174_v4 = vld [vmem:[%s978_s3 + $0x18] sm:$0xff]  ;;  %v34_v5 = vld [vmem:[%s979_s0] sm:$0xff]  ;;  %v41_v8 = vld [vmem:[%s980_s1 + $0x8] sm:$0xff] }
   0x3   :  { %v741_v6 = vpack.c.bf16 %v174_v4, %v173_v2  ;;  %686 = vmatprep.mubr.msk.f32.mxu1 %vm51_vm0, %v34_v5  ;;  %669 = vmatprep.mubr.msk.f32.mxu0 %vm51_vm0, %v34_v5  ;;  %v40_v7 = vld [vmem:[%s980_s1] sm:$0xff]  ;;  %v42_v10 = vld [vmem:[%s980_s1 + $0x10] sm:$0xff]  ;;  %v43_v11 = vld [vmem:[%s980_s1 + $0x18] sm:$0xff] }
   0x4   :  { %738 = vmatprep.subr.bf16.mxu1 %v737_v3  ;;  %v729_v9 = vpack.c.bf16 %v41_v8, %v40_v7  ;;  %v733_v12 = vpack.c.bf16 %v43_v11, %v42_v10  ;;  %v283_v13 = vld [vmem:[%s981_s5] sm:$0xff]  ;;  %v284_v14 = vld [vmem:[%s981_s5 + $0x8] sm:$0xff]  ;;  %v36_v17 = vld [vmem:[%s979_s0 + $0x10] sm:$0xff] }
   0x5   :  { %740 = vmatpush3.bf16.msra.mxu1 %v737_v3  ;;  %v35_v15 = vld [vmem:[%s979_s0 + $0x8] sm:$0xff]  ;;  %v745_v16 = vpack.c.bf16 %v284_v14, %v283_v13  ;;  %v37_v18 = vld [vmem:[%s979_s0 + $0x18] sm:$0xff]  ;;  %v38_v19 = vld [vmem:[%s979_s0 + $0x20] sm:$0xff] }
   0x6   :  { %742 = vmatprep.subr.bf16.mxu1 %v741_v6  ;;  %730 = vmatprep.subr.bf16.mxu0 %v729_v9  ;;  %v39_v20 = vld [vmem:[%s979_s0 + $0x28] sm:$0xff]  ;;  %v285_v21 = vld [vmem:[%s981_s5 + $0x10] sm:$0xff]  ;;  %v286_v22 = vld [vmem:[%s981_s5 + $0x18] sm:$0xff] }
   0x7   :  { %732 = vmatpush3.bf16.msra.mxu0 %v729_v9  ;;  %v749_v23 = vpack.c.bf16 %v286_v22, %v285_v21  ;;  %v413_v24 = vld [vmem:[%s982_s7] sm:$0xff]  ;;  %v414_v25 = vld [vmem:[%s982_s7 + $0x8] sm:$0xff]  ;;  %v415_v59 = vld [vmem:[%s982_s7 + $0x10] sm:$0xff] }
   0x8   :  { %734 = vmatprep.subr.bf16.mxu0 %v733_v12  ;;  %v753_v26 = vpack.c.bf16 %v414_v25, %v413_v24  ;;  %v594_v27 = vld [vmem:[%s983_s4] ss:$0 sm:$0xff]  ;;  %v416_v60 = vld [vmem:[%s982_s7 + $0x18] sm:$0xff] }
   0x9   :  { %744 = vmatpush3.bf16.msra.mxu1 %v741_v6  ;;  %v587_v31 = vld [vmem:[%s984_s2] ss:$0 sm:$0xff]  ;;  %v757_v61 = vpack.c.bf16 %v416_v60, %v415_v59 }
   0xa   :  { %754 = vmatprep.subr.bf16.mxu1 %v753_v26  ;;  %v601_v62 = vld [vmem:[%s986_s6] ss:$0 sm:$0xff] }
   0xb   :  { %736 = vmatpush3.bf16.msra.mxu0 %v733_v12 }
   0xc   :  { %687 = vmatmul.mubr.msk.f32.vlgmr.msra.gmra.mrb[0].mxu1 %vm51_vm0, %v35_v15  ;;  %746 = vmatprep.subr.bf16.mxu0 %v745_v16 }
   0xd   :  { %689 = vmatprep.mubr.msk.f32.mxu1 %vm51_vm0, %v36_v17  ;;  %756 = vmatpush3.bf16.msra.mxu1 %v753_v26 }
   0xe   :  { %670 = vmatmul.mubr.msk.f32.vlgmr.msra.gmra.mrb[0].mxu0 %vm51_vm0, %v35_v15  ;;  %758 = vmatprep.subr.bf16.mxu1 %v757_v61 }
   0xf   :  { %748 = vmatpush3.bf16.msra.mxu0 %v745_v16  ;;  %672 = vmatprep.mubr.msk.f32.mxu0 %vm51_vm0, %v36_v17  ;;  %v608_v17 = vld [vmem:[%s987_s8] ss:$0 sm:$0xff] }
  0x10   :  { %690 = vmatmul.mubr.msk.f32.gmra.mrb[2].mxu1 %vm51_vm0, %v37_v18  ;;  %750 = vmatprep.subr.bf16.mxu0 %v749_v23 }
  0x11   :  { %692 = vmatprep.mubr.msk.f32.mxu1 %vm51_vm0, %v38_v19  ;;  %760 = vmatpush3.bf16.msra.mxu1 %v757_v61 }
  0x12   :  { %673 = vmatmul.mubr.msk.f32.gmra.mrb[2].mxu0 %vm51_vm0, %v37_v18 }
  0x13   :  { %675 = vmatprep.mubr.msk.f32.mxu0 %vm51_vm0, %v38_v19  ;;  %752 = vmatpush3.bf16.msra.mxu0 %v749_v23 }
  0x14   :  { %693 = vmatmul.mubr.msk.f32.gmra.mrb[4].mxu1 %vm51_vm0, %v39_v20 }
  0x16   :  { %676 = vmatmul.mubr.msk.f32.gmra.mrb[4].mxu0 %vm51_vm0, %v39_v20 }
  0xdf   :  { %v688_v28 = vpop.f32.mrb[0].mxu1 }
  0xe0   :  { %v254_v29 = vadd.f32 %v688_v28, %v594_v27  ;;  %v248_v30 = vpop.f32.mrb[1].mxu1 }
  0xe1   :  { %v249_v32 = vadd.f32 %v594_v27, %v248_v30  ;;  %v671_v33 = vpop.f32.mrb[0].mxu0 }
  0xe2   :  { %v142_v36 = vadd.f32 %v671_v33, %v587_v31  ;;  %v136_v37 = vpop.f32.mrb[1].mxu0  ;;  %v278_v38 = vmax.f32 %v254_v29, 0.0 }
  0xe3   :  { %v277_v34 = vmax.f32 %v249_v32, 0.0  ;;  %v691_v35 = vpop.f32.mrb[2].mxu1  ;;  %v137_v41 = vadd.f32 %v587_v31, %v136_v37 }
  0xe4   :  { %v264_v39 = vadd.f32 %v691_v35, %v594_v27  ;;  %v258_v40 = vpop.f32.mrb[3].mxu1  ;;  %166 = vst [vmem:[%s985_s9 + $0x8] sm:$0xff] %v142_v36 }
  0xe5   :  { %v259_v42 = vadd.f32 %v594_v27, %v258_v40  ;;  %703 = vmatprep.mubr.msk.f32.mxu0 %vm51_vm0, %v277_v34  ;;  %165 = vst [vmem:[%s985_s9] sm:$0xff] %v137_v41  ;;  %v674_v43 = vpop.f32.mrb[2].mxu0 }
  0xe6   :  { %704 = vmatmul.mubr.msk.f32.vlgmr.msra.gmra.mrb[6].mxu0 %vm51_vm0, %v278_v38  ;;  %v152_v46 = vadd.f32 %v674_v43, %v587_v31  ;;  %v146_v47 = vpop.f32.mrb[3].mxu0  ;;  %v280_v48 = vmax.f32 %v264_v39, 0.0 }
  0xe7   :  { %v279_v44 = vmax.f32 %v259_v42, 0.0  ;;  %v694_v45 = vpop.f32.mrb[4].mxu1  ;;  %v147_v51 = vadd.f32 %v587_v31, %v146_v47 }
  0xe8   :  { %v274_v49 = vadd.f32 %v694_v45, %v594_v27  ;;  %v268_v50 = vpop.f32.mrb[5].mxu1  ;;  %168 = vst [vmem:[%s985_s9 + $0x18] sm:$0xff] %v152_v46 }
  0xe9   :  { %v269_v52 = vadd.f32 %v594_v27, %v268_v50  ;;  %706 = vmatprep.mubr.msk.f32.mxu0 %vm51_vm0, %v279_v44  ;;  %167 = vst [vmem:[%s985_s9 + $0x10] sm:$0xff] %v147_v51  ;;  %v677_v53 = vpop.f32.mrb[4].mxu0 }
  0xea   :  { %707 = vmatmul.mubr.msk.f32.gmra.mrb[8].mxu0 %vm51_vm0, %v280_v48  ;;  %v162_v55 = vadd.f32 %v677_v53, %v587_v31  ;;  %v156_v56 = vpop.f32.mrb[5].mxu0  ;;  %v282_v57 = vmax.f32 %v274_v49, 0.0 }
  0xeb   :  { %v281_v54 = vmax.f32 %v269_v52, 0.0  ;;  %v157_v58 = vadd.f32 %v587_v31, %v156_v56 }
  0xec   :  { %170 = vst [vmem:[%s985_s9 + $0x28] sm:$0xff] %v162_v55 }
  0xed   :  { %709 = vmatprep.mubr.msk.f32.mxu0 %vm51_vm0, %v281_v54  ;;  %169 = vst [vmem:[%s985_s9 + $0x20] sm:$0xff] %v157_v58 }
  0xee   :  { %710 = vmatmul.mubr.msk.f32.gmra.mrb[10].mxu0 %vm51_vm0, %v282_v57 }
 0x1b9   :  { %v705_v63 = vpop.f32.mrb[6].mxu0 }
 0x1ba   :  { %v384_v0 = vadd.f32 %v705_v63, %v601_v62  ;;  %v378_v1 = vpop.f32.mrb[7].mxu0 }
 0x1bb   :  { %v379_v2 = vadd.f32 %v601_v62, %v378_v1 }
 0x1bc   :  { %v408_v5 = vmax.f32 %v384_v0, 0.0 }
 0x1bd   :  { %v407_v3 = vmax.f32 %v379_v2, 0.0  ;;  %v708_v4 = vpop.f32.mrb[8].mxu0 }
 0x1be   :  { %v394_v6 = vadd.f32 %v708_v4, %v601_v62  ;;  %v388_v7 = vpop.f32.mrb[9].mxu0 }
 0x1bf   :  { %v389_v8 = vadd.f32 %v601_v62, %v388_v7  ;;  %720 = vmatprep.mubr.msk.f32.mxu1 %vm51_vm0, %v407_v3 }
 0x1c0   :  { %721 = vmatmul.mubr.msk.f32.vlgmr.msra.gmra.mrb[6].mxu1 %vm51_vm0, %v408_v5  ;;  %v410_v11 = vmax.f32 %v394_v6, 0.0 }
 0x1c1   :  { %v409_v9 = vmax.f32 %v389_v8, 0.0  ;;  %v711_v10 = vpop.f32.mrb[10].mxu0 }
 0x1c2   :  { %v404_v12 = vadd.f32 %v711_v10, %v601_v62  ;;  %v398_v13 = vpop.f32.mrb[11].mxu0 }
 0x1c3   :  { %v399_v14 = vadd.f32 %v601_v62, %v398_v13  ;;  %723 = vmatprep.mubr.msk.f32.mxu1 %vm51_vm0, %v409_v9 }
 0x1c4   :  { %724 = vmatmul.mubr.msk.f32.gmra.mrb[8].mxu1 %vm51_vm0, %v410_v11  ;;  %v412_v16 = vmax.f32 %v404_v12, 0.0 }
 0x1c5   :  { %v411_v15 = vmax.f32 %v399_v14, 0.0 }
 0x1c7   :  { %726 = vmatprep.mubr.msk.f32.mxu1 %vm51_vm0, %v411_v15 }
 0x1c8   :  { %727 = vmatmul.mubr.msk.f32.gmra.mrb[10].mxu1 %vm51_vm0, %v412_v16 }
 0x293   :  { %v722_v18 = vpop.f32.mrb[6].mxu1 }
 0x294   :  { %v514_v19 = vadd.f32 %v722_v18, %v608_v17  ;;  %v508_v20 = vpop.f32.mrb[7].mxu1 }
 0x295   :  { %v509_v21 = vadd.f32 %v608_v17, %v508_v20 }
 0x296   :  { %v616_v22 = vmul.f32 -1.442695, %v514_v19 }
 0x297   :  { %v615_v23 = vmul.f32 -1.442695, %v509_v21  ;;  %v725_v24 = vpop.f32.mrb[8].mxu1 }
 0x298   :  { %761 = vpow2.f32 %v616_v22  ;;  %v524_v25 = vadd.f32 %v725_v24, %v608_v17  ;;  %v518_v26 = vpop.f32.mrb[9].mxu1 }
 0x299   :  { %763 = vpow2.f32 %v615_v23  ;;  %v519_v27 = vadd.f32 %v608_v17, %v518_v26 }
 0x29a   :  { %v618_v28 = vmul.f32 -1.442695, %v524_v25 }
 0x29b   :  { %v617_v29 = vmul.f32 -1.442695, %v519_v27  ;;  %v728_v30 = vpop.f32.mrb[10].mxu1 }
 0x29c   :  { %765 = vpow2.f32 %v618_v28  ;;  %v534_v31 = vadd.f32 %v728_v30, %v608_v17  ;;  %v528_v32 = vpop.f32.mrb[11].mxu1 }
 0x29d   :  { %767 = vpow2.f32 %v617_v29  ;;  %v529_v33 = vadd.f32 %v608_v17, %v528_v32 }
 0x29e   :  { %v620_v34 = vmul.f32 -1.442695, %v534_v31 }
 0x29f   :  { %v619_v35 = vmul.f32 -1.442695, %v529_v33 }
 0x2a0   :  { %769 = vpow2.f32 %v620_v34 }
 0x2a1   :  { %771 = vpow2.f32 %v619_v35 }
 0x2a2   :  { %v762_v36 = vpop.eup %761 }
 0x2a3   :  { %v764_v37 = vpop.eup %763  ;;  %v556_v38 = vadd.f32 1.0, %v762_v36 }
 0x2a4   :  { %v555_v39 = vadd.f32 1.0, %v764_v37 }
 0x2a5   :  { %773 = vrcp.f32 %v556_v38 }
 0x2a6   :  { %v766_v40 = vpop.eup %765  ;;  %775 = vrcp.f32 %v555_v39 }
 0x2a7   :  { %v768_v41 = vpop.eup %767  ;;  %v558_v42 = vadd.f32 1.0, %v766_v40 }
 0x2a8   :  { %v557_v43 = vadd.f32 1.0, %v768_v41 }
 0x2a9   :  { %777 = vrcp.f32 %v558_v42 }
 0x2aa   :  { %v770_v44 = vpop.eup %769  ;;  %779 = vrcp.f32 %v557_v43 }
 0x2ab   :  { %v772_v45 = vpop.eup %771  ;;  %v560_v46 = vadd.f32 1.0, %v770_v44 }
 0x2ac   :  { %v559_v47 = vadd.f32 1.0, %v772_v45 }
 0x2ad   :  { %781 = vrcp.f32 %v560_v46 }
 0x2ae   :  { %783 = vrcp.f32 %v559_v47 }
 0x2af   :  { %v774_v48 = vpop.eup %773 }
 0x2b0   :  { %v776_v49 = vpop.eup %775  ;;  %574 = vst [vmem:[%s988_s10 + $0x8] sm:$0xff] %v774_v48 }
 0x2b1   :  { %573 = vst [vmem:[%s988_s10] sm:$0xff] %v776_v49 }
 0x2b3   :  { %v778_v50 = vpop.eup %777 }
 0x2b4   :  { %v780_v51 = vpop.eup %779  ;;  %576 = vst [vmem:[%s988_s10 + $0x18] sm:$0xff] %v778_v50 }
 0x2b5   :  { %575 = vst [vmem:[%s988_s10 + $0x10] sm:$0xff] %v780_v51 }
 0x2b7   :  { %v782_v52 = vpop.eup %781 }
 0x2b8   :  { %v784_v53 = vpop.eup %783  ;;  %578 = vst [vmem:[%s988_s10 + $0x28] sm:$0xff] %v782_v52 }
 0x2b9   :  { %577 = vst [vmem:[%s988_s10 + $0x20] sm:$0xff] %v784_v53 }

</bundles_post_ra>
